<compile_context>
chip_gen: v5e
topology: v5e:2x2
jax: 0.10.0
libtpu: 0.0.40
codegen_flags: <defaults>
</compile_context>

<pallas_src>
import functools

import jax
import jax.numpy as jnp
from jax.experimental import pallas as pl
from jax.experimental.pallas import tpu as pltpu

_LANES = 128
_SUBLANES = 8


def _row_quantum(dtype) -> int:
    """Minimum sublane multiple for a (rows, 128) slab of this dtype: 8 f32 / 16 bf16 / 32 int8."""
    itemsize = jnp.dtype(dtype).itemsize
    return _SUBLANES * max(1, 4 // max(1, itemsize))


def _as_lane_slab(x, row_quantum):
    """Flatten to a lane-dense (rows, 128) slab with rows % row_quantum == 0.

    Pure reshape (no copy) when numel % (row_quantum*128) == 0; otherwise only the ragged tail is
    zero-padded (zeros contribute nothing to the squared-difference sum).
    Returns (slab, true_element_count)."""
    flat = x.reshape(-1)
    n = flat.shape[0]
    quantum = row_quantum * _LANES
    n_pad = ((n + quantum - 1) // quantum) * quantum
    if n_pad != n:
        flat = jnp.pad(flat, (0, n_pad - n))
    return flat.reshape(n_pad // _LANES, _LANES), n


def _default_num_splits() -> int:
    """1 on single-TensorCore chips (v5e/v6e); 2 where one Pallas device spans 2 TCs (v4/v5p/v7x)."""
    try:
        kind = jax.devices()[0].device_kind.lower()
    except Exception:
        return 1
    if any(tag in kind for tag in ("v5e", "v5 lite", "v5lite", "v6e", "v6 lite", "v6lite")):
        return 1
    if any(tag in kind for tag in ("v7", "7x", "v4", "v5p")):
        return 2
    return 1


def _custom_loss_kernel(img_in_ref, img_out_ref, cls_in_ref, cls_out_ref,
                        out_ref, acc_ref, *,
                        scale_img, scale_cls, blocks_per_split, total_blocks,
                        valid_rows_last, ragged, has_dup):
    split = pl.program_id(0)
    step = pl.program_id(1)
    acc_rows = acc_ref.shape[0]

    @pl.when(step == 0)
    def _init():
        acc_ref[...] = jnp.zeros_like(acc_ref)

    def _accumulate(mask_tail_rows):
        # Streamed image-MSE partial: sub, mul, then grouped vreg adds into `acc_rows` independent
        # accumulator rows (no per-tile cross-lane reduce, no per-element index mask).
        d = img_in_ref[...].astype(jnp.float32) - img_out_ref[...].astype(jnp.float32)
        sq = d * d
        if mask_tail_rows:
            # Only the single ragged last block needs a sublane-row mask; every full block relies
            # on the wrapper's zero-padded tail.
            r = jax.lax.broadcasted_iota(jnp.int32, sq.shape, 0)
            sq = jnp.where(r < valid_rows_last, sq, 0.0)
        acc_ref[...] += jnp.sum(sq.reshape(-1, acc_rows, sq.shape[-1]), axis=0)

    logical_block = split * blocks_per_split + step
    if ragged:
        # Clamped duplicate blocks (logical_block >= total_blocks) fall through both guards.
        @pl.when(logical_block < total_blocks - 1)
        def _full_blocks():
            _accumulate(False)

        @pl.when(logical_block == total_blocks - 1)
        def _tail_block():
            _accumulate(True)
    elif has_dup:
        # Scalar guard only: skip the clamped duplicate blocks an oversized split maps onto.
        @pl.when(logical_block < total_blocks)
        def _guarded():
            _accumulate(False)
    else:
        _accumulate(False)

    is_last_step = step == blocks_per_split - 1

    @pl.when(is_last_step)
    def _finalize():
        # Fold the multi-row accumulator into the lane-dense (8, 128) output block; the wrapper
        # finishes the reduction with a single jnp.sum over all splits.
        acc8 = jnp.sum(acc_ref[...].reshape(-1, out_ref.shape[0], out_ref.shape[1]), axis=0)
        out_ref[...] = acc8 * scale_img

    @pl.when(is_last_step & (split == 0))
    def _add_kl():
        # KL term (deprecated 'mean': sum / total element count), computed only in split 0's
        # epilogue. cls blocks are tiny and VMEM-resident (constant index_map).
        t = cls_out_ref[...].astype(jnp.float32)     # target probabilities
        ci = cls_in_ref[...].astype(jnp.float32)     # input log-probabilities
        kl_pw = jnp.where(t > 0, t * (jnp.log(jnp.where(t > 0, t, 1.0)) - ci), 0.0)
        kl8 = jnp.sum(kl_pw.reshape(-1, out_ref.shape[0], out_ref.shape[1]), axis=0)
        out_ref[...] += kl8 * scale_cls


@functools.partial(jax.jit,
                   static_argnames=("l_img", "l_cls", "block_rows", "num_splits"))
def custom_loss(img_inputs, img_outputs, cls_inputs, cls_outputs,
                l_img=1.0, l_cls=1.0, block_rows=4096, num_splits=None):
    if num_splits is None:
        num_splits = _default_num_splits()
    num_splits = max(1, int(num_splits))

    img_q = max(_row_quantum(img_inputs.dtype), _row_quantum(img_outputs.dtype))
    cls_q = max(_row_quantum(cls_inputs.dtype), _row_quantum(cls_outputs.dtype))

    img_in_2d, n_img = _as_lane_slab(img_inputs, img_q)
    img_out_2d, _ = _as_lane_slab(img_outputs, img_q)
    cls_in_2d, n_cls = _as_lane_slab(cls_inputs, cls_q)
    cls_out_2d, _ = _as_lane_slab(cls_outputs, cls_q)

    rows = img_in_2d.shape[0]

    # Block rows: as large as requested (big streaming tiles ~85-90% of HBM roofline), but no
    # larger than one split's share, rounded to the dtype-aware sublane quantum.
    per_split_rows = -(-rows // num_splits)
    br = min(int(block_rows), per_split_rows)
    br = ((max(br, 1) + img_q - 1) // img_q) * img_q
    br = min(br, rows)

    total_blocks = -(-rows // br)
    blocks_per_split = -(-total_blocks // num_splits)
    last_block = total_blocks - 1
    ragged = (rows % br) != 0
    valid_rows_last = rows - last_block * br
    has_dup = num_splits * blocks_per_split > total_blocks

    # Multi-row accumulator: the largest of (32, 16, 8) rows dividing the block -> up to 4
    # independent add chains instead of one long one.
    if br % 32 == 0:
        acc_rows = 32
    elif br % 16 == 0:
        acc_rows = 16
    else:
        acc_rows = 8

    def img_index_map(s, i):
        # Clamp over-assigned blocks into range; the kernel's scalar pl.when guard skips their work.
        return (jnp.minimum(s * blocks_per_split + i, last_block), 0)

    kernel = functools.partial(
        _custom_loss_kernel,
        scale_img=float(l_img) / float(n_img),
        scale_cls=float(l_cls) / float(n_cls),
        blocks_per_split=blocks_per_split,
        total_blocks=total_blocks,
        valid_rows_last=valid_rows_last,
        ragged=ragged,
        has_dup=has_dup,
    )

    tile_bytes = br * _LANES * (jnp.dtype(img_in_2d.dtype).itemsize
                                + jnp.dtype(img_out_2d.dtype).itemsize)
    cls_bytes = (cls_in_2d.size * jnp.dtype(cls_in_2d.dtype).itemsize
                 + cls_out_2d.size * jnp.dtype(cls_out_2d.dtype).itemsize)
    # 2 pipeline buffers per streamed image tile + resident cls blocks + headroom, capped at 48 MiB
    # so v7x (64 MiB physical VMEM per TC) keeps slack for compiler-internal scratch.
    vmem_limit = int(min(2 * tile_bytes + 2 * cls_bytes + (8 << 20), 48 << 20))

    out = pl.pallas_call(
        kernel,
        out_shape=jax.ShapeDtypeStruct((num_splits * _SUBLANES, _LANES), jnp.float32),
        grid_spec=pltpu.PrefetchScalarGridSpec(
            num_scalar_prefetch=0,
            grid=(num_splits, blocks_per_split),
            in_specs=[
                pl.BlockSpec((br, _LANES), img_index_map),
                pl.BlockSpec((br, _LANES), img_index_map),
                pl.BlockSpec((cls_in_2d.shape[0], _LANES), lambda s, i: (0, 0)),
                pl.BlockSpec((cls_out_2d.shape[0], _LANES), lambda s, i: (0, 0)),
            ],
            out_specs=pl.BlockSpec((_SUBLANES, _LANES), lambda s, i: (s, 0)),
            scratch_shapes=[pltpu.VMEM((acc_rows, _LANES), jnp.float32)],
        ),
        compiler_params=pltpu.CompilerParams(
            dimension_semantics=("parallel", "arbitrary"),
            vmem_limit_bytes=vmem_limit,
        ),
    )(img_in_2d, img_out_2d, cls_in_2d, cls_out_2d)

    # Each split's (8,128) block holds its scaled partial sums (split 0 also carries the KL term);
    # a single lane-dense sum finishes the reduction.
    return jnp.sum(out)


def _reference_loss(img_inputs, img_outputs, cls_inputs, cls_outputs,
                    l_img=1.0, l_cls=1.0):
    """Pure-JAX reference mirroring the PyTorch module."""
    ii = img_inputs.reshape(-1).astype(jnp.float32)
    io = img_outputs.reshape(-1).astype(jnp.float32)
    mse = jnp.mean((ii - io) ** 2)
    t = cls_outputs.astype(jnp.float32)
    ci = cls_inputs.astype(jnp.float32)
    kl_pw = jnp.where(t > 0, t * (jnp.log(jnp.where(t > 0, t, 1.0)) - ci), 0.0)
    kl = jnp.sum(kl_pw) / t.size
    return l_img * mse + l_cls * kl


if __name__ == "__main__":
    key = jax.random.PRNGKey(0)
    ks = jax.random.split(key, 12)

    # Case 1: fast path (numel % quantum == 0 -> no padded copy), default block size / splits.
    img_in_a = jax.random.normal(ks[0], (2, 4, 16, 16), dtype=jnp.float32)
    img_out_a = jax.random.normal(ks[1], (2, 4, 16, 16), dtype=jnp.float32)
    cls_in_a = jax.nn.log_softmax(jax.random.normal(ks[2], (2, 8), dtype=jnp.float32), axis=-1)
    cls_out_a = jax.nn.softmax(jax.random.normal(ks[3], (2, 8), dtype=jnp.float32), axis=-1)
    loss_a = jax.block_until_ready(custom_loss(img_in_a, img_out_a, cls_in_a, cls_out_a))
    ref_a = _reference_loss(img_in_a, img_out_a, cls_in_a, cls_out_a)
    assert jnp.allclose(loss_a, ref_a, rtol=1e-5, atol=1e-5), (loss_a, ref_a)

    # Case 2: ragged element count (tail zero-pad) with a multi-step grid (small block_rows).
    img_in_b = jax.random.normal(ks[4], (2, 3, 20, 20), dtype=jnp.float32)
    img_out_b = jax.random.normal(ks[5], (2, 3, 20, 20), dtype=jnp.float32)
    cls_in_b = jax.nn.log_softmax(jax.random.normal(ks[6], (2, 10), dtype=jnp.float32), axis=-1)
    cls_out_b = jax.nn.softmax(jax.random.normal(ks[7], (2, 10), dtype=jnp.float32), axis=-1)
    loss_b = jax.block_until_ready(
        custom_loss(img_in_b, img_out_b, cls_in_b, cls_out_b,
                    l_img=0.7, l_cls=1.3, block_rows=8))
    ref_b = _reference_loss(img_in_b, img_out_b, cls_in_b, cls_out_b, l_img=0.7, l_cls=1.3)
    assert jnp.allclose(loss_b, ref_b, rtol=1e-5, atol=1e-5), (loss_b, ref_b)

    # Case 3: forced 2-way split whose last block is ragged -> exercises the row-masked tail path.
    loss_c = jax.block_until_ready(
        custom_loss(img_in_b, img_out_b, cls_in_b, cls_out_b,
                    l_img=0.5, l_cls=2.0, block_rows=16, num_splits=2))
    ref_c = _reference_loss(img_in_b, img_out_b, cls_in_b, cls_out_b, l_img=0.5, l_cls=2.0)
    assert jnp.allclose(loss_c, ref_c, rtol=1e-5, atol=1e-5), (loss_c, ref_c)

    # Case 4: forced 2-way split with an odd block count -> exercises the clamped-duplicate guard.
    loss_d = jax.block_until_ready(
        custom_loss(img_in_b, img_out_b, cls_in_b, cls_out_b, block_rows=8, num_splits=2))
    ref_d = _reference_loss(img_in_b, img_out_b, cls_in_b, cls_out_b)
    assert jnp.allclose(loss_d, ref_d, rtol=1e-5, atol=1e-5), (loss_d, ref_d)

    # Case 5: bf16 images (dtype-aware sublane quantum; native-dtype streaming, f32 in-kernel).
    img_in_e = jax.random.normal(ks[8], (2, 4, 16, 16), dtype=jnp.bfloat16)
    img_out_e = jax.random.normal(ks[9], (2, 4, 16, 16), dtype=jnp.bfloat16)
    cls_in_e = jax.nn.log_softmax(jax.random.normal(ks[10], (2, 8), dtype=jnp.float32), axis=-1)
    cls_out_e = jax.nn.softmax(jax.random.normal(ks[11], (2, 8), dtype=jnp.float32), axis=-1)
    loss_e = jax.block_until_ready(custom_loss(img_in_e, img_out_e, cls_in_e, cls_out_e))
    ref_e = _reference_loss(img_in_e, img_out_e, cls_in_e, cls_out_e)
    assert jnp.allclose(loss_e, ref_e, rtol=1e-5, atol=1e-5), (loss_e, ref_e)

    print("KERNEL_OK")
</pallas_src>

<mosaic_0001>
module attributes {stable_mosaic.version = 11 : i64} {
  func.func @_custom_loss_kernel(%arg0: i32, %arg1: i32, %arg2: memref<16x128xf32, #tpu.memory_space<vmem>>, %arg3: memref<16x128xf32, #tpu.memory_space<vmem>>, %arg4: memref<8x128xf32, #tpu.memory_space<vmem>>, %arg5: memref<8x128xf32, #tpu.memory_space<vmem>>, %arg6: memref<8x128xf32, #tpu.memory_space<vmem>>, %arg7: memref<16x128xf32, #tpu.memory_space<vmem>>) attributes {dimension_semantics = [#tpu.dimension_semantics<parallel>, #tpu.dimension_semantics<arbitrary>], iteration_bounds = array<i64: 1, 1>, scalar_prefetch = 0 : i64, scratch_operands = 1 : i64, tpu.core_type = #tpu.core_type<tc>, window_params = [{transform_indices = @transform_0, window_bounds = array<i64: 16, 128>}, {transform_indices = @transform_1, window_bounds = array<i64: 16, 128>}, {pipeline_mode = #tpu.pipeline_mode<synchronous>, transform_indices = @transform_2, window_bounds = array<i64: 8, 128>}, {pipeline_mode = #tpu.pipeline_mode<synchronous>, transform_indices = @transform_3, window_bounds = array<i64: 8, 128>}, {transform_indices = @transform_4, window_bounds = array<i64: 8, 128>}]} {
    %c0_i32 = arith.constant 0 : i32
    %0 = arith.cmpi eq, %arg1, %c0_i32 : i32
    %1 = arith.extui %0 : i1 to i32
    %c0_i32_0 = arith.constant 0 : i32
    %2 = arith.cmpi ne, %1, %c0_i32_0 : i32
    scf.if %2 {
      %cst_12 = arith.constant 0.000000e+00 : f32
      %19 = vector.broadcast %cst_12 : f32 to vector<16x128xf32>
      %c0_13 = arith.constant 0 : index
      %c0_14 = arith.constant 0 : index
      %20 = vector.load %arg7[%c0_13, %c0_14] : memref<16x128xf32, #tpu.memory_space<vmem>>, vector<16x128xf32>
      tpu.vector_store %arg7[%c0_13, %c0_14], %19 {strides = array<i32>} : memref<16x128xf32, #tpu.memory_space<vmem>>, vector<16x128xf32>,
    } else {
    }
    %c0 = arith.constant 0 : index
    %c0_1 = arith.constant 0 : index
    %3 = vector.load %arg2[%c0, %c0_1] : memref<16x128xf32, #tpu.memory_space<vmem>>, vector<16x128xf32>
    %c0_2 = arith.constant 0 : index
    %c0_3 = arith.constant 0 : index
    %4 = vector.load %arg3[%c0_2, %c0_3] : memref<16x128xf32, #tpu.memory_space<vmem>>, vector<16x128xf32>
    %5 = arith.subf %3, %4 : vector<16x128xf32>
    %6 = arith.mulf %5, %5 : vector<16x128xf32>
    %c0_4 = arith.constant 0 : index
    %c0_5 = arith.constant 0 : index
    %7 = vector.load %arg7[%c0_4, %c0_5] : memref<16x128xf32, #tpu.memory_space<vmem>>, vector<16x128xf32>
    %8 = vector.shape_cast %6 : vector<16x128xf32> to vector<1x16x128xf32>
    %cst = arith.constant dense<0.000000e+00> : vector<16x128xf32>
    %9 = vector.multi_reduction <add>, %8, %cst [0] : vector<1x16x128xf32> to vector<16x128xf32>
    %10 = arith.addf %7, %9 : vector<16x128xf32>
    %c0_6 = arith.constant 0 : index
    %c0_7 = arith.constant 0 : index
    %11 = vector.load %arg7[%c0_6, %c0_7] : memref<16x128xf32, #tpu.memory_space<vmem>>, vector<16x128xf32>
    tpu.vector_store %arg7[%c0_6, %c0_7], %10 {strides = array<i32>} : memref<16x128xf32, #tpu.memory_space<vmem>>, vector<16x128xf32>,
    %c0_i32_8 = arith.constant 0 : i32
    %12 = arith.cmpi eq, %arg1, %c0_i32_8 : i32
    %13 = arith.extui %12 : i1 to i32
    %c0_i32_9 = arith.constant 0 : i32
    %14 = arith.cmpi ne, %13, %c0_i32_9 : i32
    scf.if %14 {
      %c0_12 = arith.constant 0 : index
      %c0_13 = arith.constant 0 : index
      %19 = vector.load %arg7[%c0_12, %c0_13] : memref<16x128xf32, #tpu.memory_space<vmem>>, vector<16x128xf32>
      %20 = vector.shape_cast %19 : vector<16x128xf32> to vector<2x8x128xf32>
      %cst_14 = arith.constant dense<0.000000e+00> : vector<8x128xf32>
      %21 = vector.multi_reduction <add>, %20, %cst_14 [0] : vector<2x8x128xf32> to vector<8x128xf32>
      %cst_15 = arith.constant 4.8828125E-4 : f32
      %22 = vector.broadcast %cst_15 : f32 to vector<8x128xf32>
      %23 = arith.mulf %21, %22 : vector<8x128xf32>
      %c0_16 = arith.constant 0 : index
      %c0_17 = arith.constant 0 : index
      %24 = vector.load %arg6[%c0_16, %c0_17] : memref<8x128xf32, #tpu.memory_space<vmem>>, vector<8x128xf32>
      tpu.vector_store %arg6[%c0_16, %c0_17], %23 {strides = array<i32>} : memref<8x128xf32, #tpu.memory_space<vmem>>, vector<8x128xf32>,
    } else {
    }
    %c0_i32_10 = arith.constant 0 : i32
    %15 = arith.cmpi eq, %arg0, %c0_i32_10 : i32
    %16 = arith.andi %12, %15 : i1
    %17 = arith.extui %16 : i1 to i32
    %c0_i32_11 = arith.constant 0 : i32
    %18 = arith.cmpi ne, %17, %c0_i32_11 : i32
    scf.if %18 {
      %c0_12 = arith.constant 0 : index
      %c0_13 = arith.constant 0 : index
      %19 = vector.load %arg5[%c0_12, %c0_13] : memref<8x128xf32, #tpu.memory_space<vmem>>, vector<8x128xf32>
      %c0_14 = arith.constant 0 : index
      %c0_15 = arith.constant 0 : index
      %20 = vector.load %arg4[%c0_14, %c0_15] : memref<8x128xf32, #tpu.memory_space<vmem>>, vector<8x128xf32>
      %cst_16 = arith.constant 0.000000e+00 : f32
      %21 = vector.broadcast %cst_16 : f32 to vector<8x128xf32>
      %22 = arith.cmpf ogt, %19, %21 : vector<8x128xf32>
      %cst_17 = arith.constant 0.000000e+00 : f32
      %23 = vector.broadcast %cst_17 : f32 to vector<8x128xf32>
      %24 = arith.cmpf ogt, %19, %23 : vector<8x128xf32>
      %cst_18 = arith.constant 1.000000e+00 : f32
      %25 = vector.broadcast %cst_18 : f32 to vector<8x128xf32>
      %26 = arith.select %24, %19, %25 : vector<8x128xi1>, vector<8x128xf32>
      %27 = math.log %26 : vector<8x128xf32>
      %28 = arith.subf %27, %20 : vector<8x128xf32>
      %29 = arith.mulf %19, %28 : vector<8x128xf32>
      %cst_19 = arith.constant 0.000000e+00 : f32
      %30 = vector.broadcast %cst_19 : f32 to vector<8x128xf32>
      %31 = arith.select %22, %29, %30 : vector<8x128xi1>, vector<8x128xf32>
      %32 = vector.shape_cast %31 : vector<8x128xf32> to vector<1x8x128xf32>
      %cst_20 = arith.constant dense<0.000000e+00> : vector<8x128xf32>
      %33 = vector.multi_reduction <add>, %32, %cst_20 [0] : vector<1x8x128xf32> to vector<8x128xf32>
      %c0_21 = arith.constant 0 : index
      %c0_22 = arith.constant 0 : index
      %34 = vector.load %arg6[%c0_21, %c0_22] : memref<8x128xf32, #tpu.memory_space<vmem>>, vector<8x128xf32>
      %cst_23 = arith.constant 6.250000e-02 : f32
      %35 = vector.broadcast %cst_23 : f32 to vector<8x128xf32>
      %36 = arith.mulf %33, %35 : vector<8x128xf32>
      %37 = arith.addf %34, %36 : vector<8x128xf32>
      %c0_24 = arith.constant 0 : index
      %c0_25 = arith.constant 0 : index
      %38 = vector.load %arg6[%c0_24, %c0_25] : memref<8x128xf32, #tpu.memory_space<vmem>>, vector<8x128xf32>
      tpu.vector_store %arg6[%c0_24, %c0_25], %37 {strides = array<i32>} : memref<8x128xf32, #tpu.memory_space<vmem>>, vector<8x128xf32>,
    } else {
    }
    return
  }
  func.func @transform_0(%arg0: i32, %arg1: i32) -> (i32, i32) {
    %c1_i32 = arith.constant 1 : i32
    %0 = arith.muli %arg0, %c1_i32 : i32
    %1 = arith.addi %0, %arg1 : i32
    %c0_i32 = arith.constant 0 : i32
    %2 = arith.minsi %1, %c0_i32 : i32
    %c0_i32_0 = arith.constant 0 : i32
    %c0_i32_1 = arith.constant 0 : i32
    return %2, %c0_i32_0 : i32, i32
  }
  func.func @transform_1(%arg0: i32, %arg1: i32) -> (i32, i32) {
    %c1_i32 = arith.constant 1 : i32
    %0 = arith.muli %arg0, %c1_i32 : i32
    %1 = arith.addi %0, %arg1 : i32
    %c0_i32 = arith.constant 0 : i32
    %2 = arith.minsi %1, %c0_i32 : i32
    %c0_i32_0 = arith.constant 0 : i32
    %c0_i32_1 = arith.constant 0 : i32
    return %2, %c0_i32_0 : i32, i32
  }
  func.func @transform_2(%arg0: i32, %arg1: i32) -> (i32, i32) {
    %c0_i32 = arith.constant 0 : i32
    %c0_i32_0 = arith.constant 0 : i32
    %c0_i32_1 = arith.constant 0 : i32
    return %c0_i32, %c0_i32_0 : i32, i32
  }
  func.func @transform_3(%arg0: i32, %arg1: i32) -> (i32, i32) {
    %c0_i32 = arith.constant 0 : i32
    %c0_i32_0 = arith.constant 0 : i32
    %c0_i32_1 = arith.constant 0 : i32
    return %c0_i32, %c0_i32_0 : i32, i32
  }
  func.func @transform_4(%arg0: i32, %arg1: i32) -> (i32, i32) {
    %c0_i32 = arith.constant 0 : i32
    %c0_i32_0 = arith.constant 0 : i32
    return %arg0, %c0_i32 : i32, i32
  }
}

</mosaic_0001>

<bundles_post_ra>
// kernel: custom_loss.1
= control target key start
LH: loop header
LB: loop body
LE: loop exit
PB: predicated region body
PF: predicated region fallthrough
CT: control target
= control target key end

     0   :  { %s194_s0 = inlined_call_operand.vmem [shape: f32[16,128], index: 0, kind: input, shape index: {}]   ;;  %s195_s1 = inlined_call_operand.vmem [shape: f32[16,128], index: 1, kind: input, shape index: {}]   ;;  %s196_s3 = inlined_call_operand.vmem [shape: f32[8,128], index: 3, kind: input, shape index: {}]   ;;  %s197_s2 = inlined_call_operand.vmem [shape: f32[8,128], index: 2, kind: input, shape index: {}]   ;;  %s198_s4 = inlined_call_operand.vmem [shape: f32[8,128], index: 4, kind: output, shape index: {}]  }
   0x1   :  { %v87_v0 = vld [vmem:[%s194_s0] sm:$0xff]  ;;  %v88_v1 = vld [vmem:[%s194_s0 + $0x8] sm:$0xff] }
   0x2   :  { %v89_v2 = vld [vmem:[%s195_s1] sm:$0xff]  ;;  %v90_v3 = vld [vmem:[%s195_s1 + $0x8] sm:$0xff] }
   0x3   :  { %v116_v4 = vld [vmem:[%s196_s3] sm:$0xff]  ;;  %v91_v6 = vsub.f32 %v87_v0, %v89_v2  ;;  %v92_v7 = vsub.f32 %v88_v1, %v90_v3 }
   0x4   :  { %vm118_vm0 = vcmp.gt.f32.partialorder %v116_v4, 0.0  ;;  %v117_v11 = vld [vmem:[%s197_s2] sm:$0xff] }
   0x5   :  { %v119_v5 = vsel %vm118_vm0, %v116_v4, 1.0  ;;  %v93_v8 = vmul.f32 %v91_v6, %v91_v6  ;;  %v94_v9 = vmul.f32 %v92_v7, %v92_v7 }
   0x6   :  { %146 = vlog2.f32 %v119_v5 }
   0x7   :  { %v108_v13 = vadd.f32 %v94_v9, %v93_v8 }
   0x9   :  { %v109_v16 = vmul.f32 0.00048828125, %v108_v13 }
   0xc   :  { %v147_v10 = vpop.eup %146 }
   0xd   :  { %v121_v12 = vmul.f32 0.6931472, %v147_v10 }
   0xf   :  { %v122_v14 = vsub.f32 %v121_v12, %v117_v11 }
  0x11   :  { %v123_v15 = vmul.f32 %v122_v14, %v116_v4 }
  0x13   :  { %v124_v17 = vsel %vm118_vm0, %v123_v15, 0.0 }
  0x14   :  { %v127_v18 = vmul.f32 0.0625, %v124_v17 }
  0x16   :  { %v128_v19 = vadd.f32 %v127_v18, %v109_v16 }
  0x18   :  { %129 = vst [vmem:[%s198_s4] sm:$0xff] %v128_v19 }

</bundles_post_ra>
